<compile_context>
chip_gen: v6e
topology: v6e:2x2x1
jax: 0.10.0
libtpu: 0.0.40
codegen_flags: <defaults>
</compile_context>

<pallas_src>
import jax
import jax.numpy as jnp
import numpy as np
from jax.experimental import pallas as pl
from jax.experimental.pallas import tpu as pltpu


HIDDEN = 128
BF16_SUBLANE = 16   # minimum bf16 sublane packing (bf16 tile is (16, 128))


def _round_up(n, m):
    return ((n + m - 1) // m) * m


def _cdiv(a, b):
    return (a + b - 1) // b


def _dqn_kernel(x_ref, w1_ref, b1_ref, w2_ref, b2_ref, w3_ref, b3_ref, o_ref):
    # 3 MXU matmuls (bf16 operands, f32 accumulation) + f32 VPU bias/ReLU.
    # x is cast to bf16 in-kernel: no padded/casted copy of x in HBM.
    x = x_ref[...].astype(jnp.bfloat16)                                 # (TB, obs)
    h1 = jnp.dot(x, w1_ref[...], preferred_element_type=jnp.float32) + b1_ref[...]
    h1 = jnp.maximum(h1, 0.0)
    h2 = (jnp.dot(h1.astype(jnp.bfloat16), w2_ref[...],
                  preferred_element_type=jnp.float32) + b2_ref[...])
    h2 = jnp.maximum(h2, 0.0)
    o_ref[...] = (jnp.dot(h2.astype(jnp.bfloat16), w3_ref[...],
                          preferred_element_type=jnp.float32) + b3_ref[...])


def _choose_batch_tile(B):
    """Batch tile TB: multiple of 16 (bf16 sublane packing).
    - small B: a single tile (splitting only adds ~0.35us/step overhead)
    - large B: >=2 (>=4 when B>=2048) grid steps, tile <= ~4096, so padding
      waste is bounded to one 16-row group and v7x gets steps to shard."""
    if B <= 512:
        return _round_up(max(B, 1), BF16_SUBLANE)
    n_tiles = max(2, _cdiv(B, 4096))
    if B >= 2048:
        n_tiles = max(n_tiles, 4)
    return _round_up(_cdiv(B, n_tiles), BF16_SUBLANE)


def prepare_params(params):
    """One-time kernel layout: bf16 weights in (in, out), f32 (1, out) biases.
    Call once; dqn_forward does no per-call weight re-layout."""
    return {
        "w1": params["w1"].astype(jnp.bfloat16),
        "b1": params["b1"].reshape(1, -1).astype(jnp.float32),
        "w2": params["w2"].astype(jnp.bfloat16),
        "b2": params["b2"].reshape(1, -1).astype(jnp.float32),
        "w3": params["w3"].astype(jnp.bfloat16),
        "b3": params["b3"].reshape(1, -1).astype(jnp.float32),
    }


def dqn_forward(x, prepared):
    """x: (B, obs_size) float32. prepared: output of prepare_params()."""
    w1, b1, w2, b2, w3, b3 = (prepared["w1"], prepared["b1"], prepared["w2"],
                              prepared["b2"], prepared["w3"], prepared["b3"])
    B, obs = x.shape
    action_size = w3.shape[1]

    TB = _choose_batch_tile(B)
    B_pad = _round_up(B, TB)
    grid = (B_pad // TB,)

    # Only the batch dim is padded (lanes stay at the true obs / action width).
    x_p = x if B_pad == B else jnp.pad(x, ((0, B_pad - B), (0, 0)))

    resident = lambda i: (0, 0)   # weights/biases: same block every grid step
    flops = 2 * B_pad * (obs * HIDDEN + HIDDEN * HIDDEN + HIDDEN * action_size)
    bytes_accessed = (
        B_pad * obs * 4                        # x (f32, unpadded lanes)
        + B_pad * action_size * 4              # out (f32, unpadded lanes)
        + (w1.size + w2.size + w3.size) * 2    # bf16 weights
        + (b1.size + b2.size + b3.size) * 4    # f32 biases
    )

    out = pl.pallas_call(
        _dqn_kernel,
        out_shape=jax.ShapeDtypeStruct((B_pad, action_size), jnp.float32),
        grid=grid,
        in_specs=[
            pl.BlockSpec((TB, obs), lambda i: (i, 0)),       # x: batch-tiled, unpadded
            pl.BlockSpec((obs, HIDDEN), resident),           # w1 (VMEM-resident)
            pl.BlockSpec((1, HIDDEN), resident),             # b1
            pl.BlockSpec((HIDDEN, HIDDEN), resident),        # w2
            pl.BlockSpec((1, HIDDEN), resident),             # b2
            pl.BlockSpec((HIDDEN, action_size), resident),   # w3 (unpadded N)
            pl.BlockSpec((1, action_size), resident),        # b3
        ],
        out_specs=pl.BlockSpec((TB, action_size), lambda i: (i, 0)),
        compiler_params=pltpu.CompilerParams(
            dimension_semantics=("parallel",),
            vmem_limit_bytes=32 * 1024 * 1024,   # v5e default (16 MiB) is tight at TB~4096
        ),
        cost_estimate=pl.CostEstimate(
            flops=flops, transcendentals=0, bytes_accessed=bytes_accessed),
    )(x_p, w1, b1, w2, b2, w3, b3)

    return out if B_pad == B else out[:B]


def init_dqn_params(key, obs_size, action_size):
    """Deterministic init matching nn.Linear's U(-1/sqrt(fan_in), 1/sqrt(fan_in)).
    Weights returned in (in_features, out_features) layout."""
    def linear_init(k, fan_in, fan_out):
        kw, kb = jax.random.split(k)
        bound = 1.0 / np.sqrt(fan_in)
        w = jax.random.uniform(kw, (fan_in, fan_out), jnp.float32, -bound, bound)
        b = jax.random.uniform(kb, (1, fan_out), jnp.float32, -bound, bound)
        return w, b

    k1, k2, k3 = jax.random.split(key, 3)
    w1, b1 = linear_init(k1, obs_size, HIDDEN)
    w2, b2 = linear_init(k2, HIDDEN, HIDDEN)
    w3, b3 = linear_init(k3, HIDDEN, action_size)
    return {"w1": w1, "b1": b1, "w2": w2, "b2": b2, "w3": w3, "b3": b3}


def dqn_reference(x, params):
    """bf16-operand / f32-accumulation reference matching the kernel math."""
    def lin(h, w, b):
        return jnp.dot(h.astype(jnp.bfloat16), w.astype(jnp.bfloat16),
                       preferred_element_type=jnp.float32) + b
    h1 = jnp.maximum(lin(x, params["w1"], params["b1"]), 0.0)
    h2 = jnp.maximum(lin(h1, params["w2"], params["b2"]), 0.0)
    return lin(h2, params["w3"], params["b3"])


if __name__ == "__main__":
    key = jax.random.PRNGKey(0)
    k_params, k_x = jax.random.split(key)

    batch = 2
    obs_size = 8
    action_size = 4

    params = init_dqn_params(k_params, obs_size, action_size)
    prepared = prepare_params(params)          # one-time weight layout/cast
    x = jax.random.normal(k_x, (batch, obs_size), jnp.float32)

    out = jax.block_until_ready(dqn_forward(x, prepared))

    ref = dqn_reference(x, params)
    np.testing.assert_allclose(np.asarray(out), np.asarray(ref),
                               rtol=1e-2, atol=1e-2)

    print("KERNEL_OK")
</pallas_src>

<mosaic_0001>
module attributes {stable_mosaic.version = 11 : i64} {
  func.func @_dqn_kernel(%arg0: i32, %arg1: memref<16x8xf32, #tpu.memory_space<vmem>>, %arg2: memref<8x128xbf16, #tpu.memory_space<vmem>>, %arg3: memref<1x128xf32, #tpu.memory_space<vmem>>, %arg4: memref<128x128xbf16, #tpu.memory_space<vmem>>, %arg5: memref<1x128xf32, #tpu.memory_space<vmem>>, %arg6: memref<128x4xbf16, #tpu.memory_space<vmem>>, %arg7: memref<1x4xf32, #tpu.memory_space<vmem>>, %arg8: memref<16x4xf32, #tpu.memory_space<vmem>>) attributes {dimension_semantics = [#tpu.dimension_semantics<parallel>], iteration_bounds = array<i64: 1>, scalar_prefetch = 0 : i64, scratch_operands = 0 : i64, tpu.core_type = #tpu.core_type<tc>, window_params = [{transform_indices = @transform_0, window_bounds = array<i64: 16, 8>}, {pipeline_mode = #tpu.pipeline_mode<synchronous>, transform_indices = @transform_1, window_bounds = array<i64: 8, 128>}, {pipeline_mode = #tpu.pipeline_mode<synchronous>, transform_indices = @transform_2, window_bounds = array<i64: 1, 128>}, {pipeline_mode = #tpu.pipeline_mode<synchronous>, transform_indices = @transform_3, window_bounds = array<i64: 128, 128>}, {pipeline_mode = #tpu.pipeline_mode<synchronous>, transform_indices = @transform_4, window_bounds = array<i64: 1, 128>}, {pipeline_mode = #tpu.pipeline_mode<synchronous>, transform_indices = @transform_5, window_bounds = array<i64: 128, 4>}, {pipeline_mode = #tpu.pipeline_mode<synchronous>, transform_indices = @transform_6, window_bounds = array<i64: 1, 4>}, {transform_indices = @transform_7, window_bounds = array<i64: 16, 4>}]} {
    %c0 = arith.constant 0 : index
    %c0_0 = arith.constant 0 : index
    %0 = vector.load %arg1[%c0, %c0_0] : memref<16x8xf32, #tpu.memory_space<vmem>>, vector<16x8xf32>
    %1 = arith.truncf %0 : vector<16x8xf32> to vector<16x8xbf16>
    %c0_1 = arith.constant 0 : index
    %c0_2 = arith.constant 0 : index
    %2 = vector.load %arg2[%c0_1, %c0_2] : memref<8x128xbf16, #tpu.memory_space<vmem>>, vector<8x128xbf16>
    %cst = arith.constant dense<0.000000e+00> : vector<16x128xf32>
    %3 = tpu.matmul %1, %2, %cst {dimension_numbers = #tpu.dot_dimension_numbers<[1], [0], [0], [1], [0, 0, 1, 1], [], []>} : vector<16x8xbf16>, vector<8x128xbf16>, vector<16x128xf32> -> vector<16x128xf32>
    %c0_3 = arith.constant 0 : index
    %c0_4 = arith.constant 0 : index
    %4 = vector.load %arg3[%c0_3, %c0_4] : memref<1x128xf32, #tpu.memory_space<vmem>>, vector<1x128xf32>
    %5 = vector.broadcast %4 : vector<1x128xf32> to vector<16x128xf32>
    %6 = arith.addf %3, %5 : vector<16x128xf32>
    %cst_5 = arith.constant 0.000000e+00 : f32
    %7 = vector.broadcast %cst_5 : f32 to vector<16x128xf32>
    %8 = arith.maximumf %6, %7 : vector<16x128xf32>
    %9 = arith.truncf %8 : vector<16x128xf32> to vector<16x128xbf16>
    %c0_6 = arith.constant 0 : index
    %c0_7 = arith.constant 0 : index
    %10 = vector.load %arg4[%c0_6, %c0_7] : memref<128x128xbf16, #tpu.memory_space<vmem>>, vector<128x128xbf16>
    %cst_8 = arith.constant dense<0.000000e+00> : vector<16x128xf32>
    %11 = tpu.matmul %9, %10, %cst_8 {dimension_numbers = #tpu.dot_dimension_numbers<[1], [0], [0], [1], [0, 0, 1, 1], [], []>} : vector<16x128xbf16>, vector<128x128xbf16>, vector<16x128xf32> -> vector<16x128xf32>
    %c0_9 = arith.constant 0 : index
    %c0_10 = arith.constant 0 : index
    %12 = vector.load %arg5[%c0_9, %c0_10] : memref<1x128xf32, #tpu.memory_space<vmem>>, vector<1x128xf32>
    %13 = vector.broadcast %12 : vector<1x128xf32> to vector<16x128xf32>
    %14 = arith.addf %11, %13 : vector<16x128xf32>
    %cst_11 = arith.constant 0.000000e+00 : f32
    %15 = vector.broadcast %cst_11 : f32 to vector<16x128xf32>
    %16 = arith.maximumf %14, %15 : vector<16x128xf32>
    %17 = arith.truncf %16 : vector<16x128xf32> to vector<16x128xbf16>
    %c0_12 = arith.constant 0 : index
    %c0_13 = arith.constant 0 : index
    %18 = vector.load %arg6[%c0_12, %c0_13] : memref<128x4xbf16, #tpu.memory_space<vmem>>, vector<128x4xbf16>
    %cst_14 = arith.constant dense<0.000000e+00> : vector<16x4xf32>
    %19 = tpu.matmul %17, %18, %cst_14 {dimension_numbers = #tpu.dot_dimension_numbers<[1], [0], [0], [1], [0, 0, 1, 1], [], []>} : vector<16x128xbf16>, vector<128x4xbf16>, vector<16x4xf32> -> vector<16x4xf32>
    %c0_15 = arith.constant 0 : index
    %c0_16 = arith.constant 0 : index
    %20 = vector.load %arg7[%c0_15, %c0_16] : memref<1x4xf32, #tpu.memory_space<vmem>>, vector<1x4xf32>
    %21 = vector.broadcast %20 : vector<1x4xf32> to vector<16x4xf32>
    %22 = arith.addf %19, %21 : vector<16x4xf32>
    %c0_17 = arith.constant 0 : index
    %c0_18 = arith.constant 0 : index
    %23 = vector.load %arg8[%c0_17, %c0_18] : memref<16x4xf32, #tpu.memory_space<vmem>>, vector<16x4xf32>
    tpu.vector_store %arg8[%c0_17, %c0_18], %22 {strides = array<i32>} : memref<16x4xf32, #tpu.memory_space<vmem>>, vector<16x4xf32>,
    return
  }
  func.func @transform_0(%arg0: i32) -> (i32, i32) {
    %c0_i32 = arith.constant 0 : i32
    %c0_i32_0 = arith.constant 0 : i32
    return %arg0, %c0_i32 : i32, i32
  }
  func.func @transform_1(%arg0: i32) -> (i32, i32) {
    %c0_i32 = arith.constant 0 : i32
    %c0_i32_0 = arith.constant 0 : i32
    %c0_i32_1 = arith.constant 0 : i32
    return %c0_i32, %c0_i32_0 : i32, i32
  }
  func.func @transform_2(%arg0: i32) -> (i32, i32) {
    %c0_i32 = arith.constant 0 : i32
    %c0_i32_0 = arith.constant 0 : i32
    %c0_i32_1 = arith.constant 0 : i32
    return %c0_i32, %c0_i32_0 : i32, i32
  }
  func.func @transform_3(%arg0: i32) -> (i32, i32) {
    %c0_i32 = arith.constant 0 : i32
    %c0_i32_0 = arith.constant 0 : i32
    %c0_i32_1 = arith.constant 0 : i32
    return %c0_i32, %c0_i32_0 : i32, i32
  }
  func.func @transform_4(%arg0: i32) -> (i32, i32) {
    %c0_i32 = arith.constant 0 : i32
    %c0_i32_0 = arith.constant 0 : i32
    %c0_i32_1 = arith.constant 0 : i32
    return %c0_i32, %c0_i32_0 : i32, i32
  }
  func.func @transform_5(%arg0: i32) -> (i32, i32) {
    %c0_i32 = arith.constant 0 : i32
    %c0_i32_0 = arith.constant 0 : i32
    %c0_i32_1 = arith.constant 0 : i32
    return %c0_i32, %c0_i32_0 : i32, i32
  }
  func.func @transform_6(%arg0: i32) -> (i32, i32) {
    %c0_i32 = arith.constant 0 : i32
    %c0_i32_0 = arith.constant 0 : i32
    %c0_i32_1 = arith.constant 0 : i32
    return %c0_i32, %c0_i32_0 : i32, i32
  }
  func.func @transform_7(%arg0: i32) -> (i32, i32) {
    %c0_i32 = arith.constant 0 : i32
    %c0_i32_0 = arith.constant 0 : i32
    return %arg0, %c0_i32 : i32, i32
  }
}

</mosaic_0001>

<bundles_post_ra>
// kernel: tpu_custom_call.1
= control target key start
LH: loop header
LB: loop body
LE: loop exit
PB: predicated region body
PF: predicated region fallthrough
CT: control target
= control target key end

     0   :  { %vm42_vm0 = vcmask 1043456   ;;  %v428_v0 = vmov 0.0   ;;  %vm429_vm1 = vmmov 0   ;;  %vm38_vm2 = vcmask 64512   ;;  %s565_s1 = inlined_call_operand.vmem [shape: bf16[8,128], index: 1, kind: input, shape index: {}]   ;;  %s566_s0 = inlined_call_operand.vmem [shape: f32[16,8], index: 0, kind: input, shape index: {}]   ;;  %s567_s3 = inlined_call_operand.vmem [shape: bf16[128,128], index: 3, kind: input, shape index: {}]   ;;  %s568_s5 = inlined_call_operand.vmem [shape: bf16[128,4], index: 5, kind: input, shape index: {}]   ;;  %s569_s2 = inlined_call_operand.vmem [shape: f32[1,128], index: 2, kind: input, shape index: {}]   ;;  %s570_s4 = inlined_call_operand.vmem [shape: f32[1,128], index: 4, kind: input, shape index: {}]   ;;  %s571_s6 = inlined_call_operand.vmem [shape: f32[1,4], index: 6, kind: input, shape index: {}]   ;;  %s572_s7 = inlined_call_operand.vmem [shape: f32[16,4], index: 7, kind: output, shape index: {}]  }
   0x1   :  { %364 = vmatprep.subr.bf16.mxu0 %v428_v0  ;;  %v30_v1 = vld [vmem:[%s565_s1] sm:$0xf]  ;;  %366 = vmatprep.mubr.msk.bf16.mxu0 %vm429_vm1, %v428_v0  ;;  %v28_v3 = vld [vmem:[%s566_s0 + $0x8] sm:$0xff]  ;;  %v412_v6 = vld [vmem:[%s567_s3 + $0x38] sm:$0xff]   ;;  %vm317_vm3 = vcmask 31744  }
   0x2   :  { %v27_v2 = vld [vmem:[%s566_s0] sm:$0xff]  ;;  %v44_v4 = vsel %vm42_vm0, %v30_v1, 0  ;;  %370 = vmatprep.subr.bf16.mxu1 %v428_v0  ;;  %386 = vmatprep.mubr.msk.bf16.mxu1 %vm429_vm1, %v428_v0  ;;  %v413_v7 = vld [vmem:[%s567_s3 + $0x30] sm:$0xff]   ;;  %v414_v8 = vld [vmem:[%s567_s3 + $0x28] sm:$0xff]  }
   0x3   :  { %v29_v5 = vpack.c.bf16 %v28_v3, %v27_v2  ;;  %365 = vmatpush3.bf16.msra.mxu0 %v44_v4  ;;  %371 = vmatpush3.bf16.msra.mxu1 %v412_v6  ;;  %v415_v9 = vld [vmem:[%s567_s3 + $0x20] sm:$0xff]   ;;  %v416_v10 = vld [vmem:[%s567_s3 + $0x18] sm:$0xff]   ;;  %v417_v11 = vld [vmem:[%s567_s3 + $0x10] sm:$0xff]  }
   0x4   :  { %390 = vmatprep.subr.bf16.mxu0 %v428_v0  ;;  %372 = vmatprep.subr.bf16.mxu1 %v428_v0  ;;  %v418_v12 = vld [vmem:[%s567_s3 + $0x8] sm:$0xff]   ;;  %v419_v13 = vld [vmem:[%s567_s3] sm:$0xff]   ;;  %v420_v14 = vld [vmem:[%s568_s5 + $0x38] sm:$0xff]  }
   0x5   :  { %v421_v15 = vld [vmem:[%s568_s5 + $0x30] sm:$0xff]   ;;  %v422_v16 = vld [vmem:[%s568_s5 + $0x28] sm:$0xff]   ;;  %v423_v17 = vld [vmem:[%s568_s5 + $0x20] sm:$0xff]  }
   0x6   :  { %367 = vmatmul.mubr.msk.bf16.vlgmr.msra.gmra.mxu0 %vm38_vm2, %v29_v5  ;;  %v424_v18 = vld [vmem:[%s568_s5 + $0x18] sm:$0xff]   ;;  %v324_v19 = vld [vmem:[%s569_s2] ss:$0 sm:$0xff]  ;;  %v425_v29 = vld [vmem:[%s568_s5 + $0x10] sm:$0xff]  }
   0x7   :  { %406 = vmatprep.mubr.msk.bf16.mxu0 %vm429_vm1, %v428_v0  ;;  %373 = vmatpush3.bf16.msra.mxu1 %v413_v7  ;;  %v426_v30 = vld [vmem:[%s568_s5 + $0x8] sm:$0xff]   ;;  %v427_v31 = vld [vmem:[%s568_s5] sm:$0xff]  }
   0x8   :  { %374 = vmatprep.subr.bf16.mxu1 %v428_v0  ;;  %391 = vmatpush3.bf16.msra.mxu0 %v420_v14  ;;  %v326_v32 = vld [vmem:[%s570_s4] ss:$0 sm:$0xff] }
   0x9   :  { %392 = vmatprep.subr.bf16.mxu0 %v428_v0  ;;  %v335_v42 = vld [vmem:[%s571_s6] ss:$0 sm:$0xff] }
   0xb   :  { %375 = vmatpush3.bf16.msra.mxu1 %v414_v8 }
   0xc   :  { %376 = vmatprep.subr.bf16.mxu1 %v428_v0  ;;  %393 = vmatpush3.bf16.msra.mxu0 %v421_v15 }
   0xd   :  { %394 = vmatprep.subr.bf16.mxu0 %v428_v0 }
   0xf   :  { %377 = vmatpush3.bf16.msra.mxu1 %v415_v9 }
  0x10   :  { %378 = vmatprep.subr.bf16.mxu1 %v428_v0  ;;  %395 = vmatpush3.bf16.msra.mxu0 %v422_v16 }
  0x11   :  { %396 = vmatprep.subr.bf16.mxu0 %v428_v0 }
  0x13   :  { %379 = vmatpush3.bf16.msra.mxu1 %v416_v10 }
  0x14   :  { %380 = vmatprep.subr.bf16.mxu1 %v428_v0  ;;  %397 = vmatpush3.bf16.msra.mxu0 %v423_v17 }
  0x15   :  { %398 = vmatprep.subr.bf16.mxu0 %v428_v0 }
  0x17   :  { %381 = vmatpush3.bf16.msra.mxu1 %v417_v11 }
  0x18   :  { %382 = vmatprep.subr.bf16.mxu1 %v428_v0  ;;  %399 = vmatpush3.bf16.msra.mxu0 %v424_v18 }
  0x19   :  { %400 = vmatprep.subr.bf16.mxu0 %v428_v0 }
  0x1b   :  { %383 = vmatpush3.bf16.msra.mxu1 %v418_v12 }
  0x1c   :  { %384 = vmatprep.subr.bf16.mxu1 %v428_v0  ;;  %401 = vmatpush3.bf16.msra.mxu0 %v425_v29 }
  0x1d   :  { %402 = vmatprep.subr.bf16.mxu0 %v428_v0 }
  0x1f   :  { %385 = vmatpush3.bf16.msra.mxu1 %v419_v13 }
  0x20   :  { %403 = vmatpush3.bf16.msra.mxu0 %v426_v30 }
  0x21   :  { %404 = vmatprep.subr.bf16.mxu0 %v428_v0 }
  0x24   :  { %405 = vmatpush3.bf16.msra.mxu0 %v427_v31 }
  0xc6   :  { %v80_v20 = vpop.f32.mrf.mxu0 }
  0xc7   :  { %v81_v22 = vadd.f32 %v324_v19, %v80_v20 }
  0xc8   :  { %v368_v21 = vpop.f32.mrf.mxu0 }
  0xc9   :  { %v87_v26 = vmax.f32 %v81_v22, 0.0 }
  0xca   :  { %v83_v23 = vpop.f32.mrf.mxu0 }
  0xcb   :  { %v84_v24 = vadd.f32 %v324_v19, %v83_v23 }
  0xcc   :  { %v369_v25 = vpop.f32.mrf.mxu0 }
  0xcd   :  { %v88_v27 = vmax.f32 %v84_v24, 0.0 }
  0xcf   :  { %v89_v28 = vpack.c.bf16 %v88_v27, %v87_v26 }
  0xd1   :  { %387 = vmatmul.mubr.bf16.vlgmr.msra.gmra.mxu1 %v89_v28 }
 0x191   :  { %v195_v33 = vpop.f32.mrf.mxu1 }
 0x192   :  { %v196_v35 = vadd.f32 %v326_v32, %v195_v33 }
 0x193   :  { %v388_v34 = vpop.f32.mrf.mxu1 }
 0x194   :  { %v202_v39 = vmax.f32 %v196_v35, 0.0 }
 0x195   :  { %v198_v36 = vpop.f32.mrf.mxu1 }
 0x196   :  { %v199_v37 = vadd.f32 %v326_v32, %v198_v36 }
 0x197   :  { %v389_v38 = vpop.f32.mrf.mxu1 }
 0x198   :  { %v203_v40 = vmax.f32 %v199_v37, 0.0 }
 0x19a   :  { %v204_v41 = vpack.c.bf16 %v203_v40, %v202_v39 }
 0x19c   :  { %407 = vmatmul.mubr.bf16.vlgmr.msra.gmra.mxu0 %v204_v41 }
 0x25c   :  { %v310_v43 = vpop.f32.mrf.mxu0 }
 0x25d   :  { %v311_v44 = vadd.f32 %v335_v42, %v310_v43 }
 0x25e   :  { %v408_v45 = vpop.f32.mrf.mxu0 }
 0x25f   :  { %318 = vst.msk [vmem:[%s572_s7] sm:$0xff] %vm317_vm3, %v311_v44 }
 0x260   :  { %v313_v46 = vpop.f32.mrf.mxu0 }
 0x261   :  { %v314_v47 = vadd.f32 %v335_v42, %v313_v46 }
 0x262   :  { %v409_v48 = vpop.f32.mrf.mxu0 }
 0x263   :  { %319 = vst.msk [vmem:[%s572_s7 + $0x8] sm:$0xff] %vm317_vm3, %v314_v47 }

</bundles_post_ra>
